<compile_context>
chip_gen: v6e
topology: v6e:2x2x1
jax: 0.10.0
libtpu: 0.0.40
codegen_flags: <defaults>
</compile_context>

<pallas_src>
import functools

import jax
import jax.numpy as jnp
from jax.experimental import pallas as pl
from jax.experimental.pallas import tpu as pltpu

BN_EPS = 1e-5
LANE = 128  # TPU lane width; pad all feature axes to a multiple of this.


def _round_up(n, m):
    return ((n + m - 1) // m) * m


# ---------------------------------------------------------------------------
# Fused kernel: whole MLP in one pass, all activations VMEM-resident.
# ---------------------------------------------------------------------------
def _make_fused_mlp_kernel(num_layers):
    """Builds a kernel taking (x_ref, w0, b0, ..., w{L-1}, b{L-1}, o_ref)."""

    def kernel(*refs):
        x_ref = refs[0]
        o_ref = refs[-1]
        wb = refs[1:-1]

        h = x_ref[...]  # (N, F0_pad) f32

        # Hidden blocks: Linear -> BatchNorm1d (batch stats) -> ReLU
        for i in range(num_layers - 1):
            w = wb[2 * i][...]          # (Fin_pad, Fout_pad)
            b = wb[2 * i + 1][...]      # (1, Fout_pad) -> broadcasts over N
            y = jnp.dot(h, w, preferred_element_type=jnp.float32) + b
            mean = jnp.mean(y, axis=0, keepdims=True)
            yc = y - mean                                  # reused temp
            var = jnp.mean(yc * yc, axis=0, keepdims=True)  # biased variance
            h = jnp.maximum(yc * jax.lax.rsqrt(var + BN_EPS), 0.0)

        # Output block: Linear -> Sigmoid
        w = wb[-2][...]
        b = wb[-1][...]
        y = jnp.dot(h, w, preferred_element_type=jnp.float32) + b
        o_ref[...] = jax.nn.sigmoid(y).astype(o_ref.dtype)

    return kernel


def _full_spec(shape):
    # Full-array block (block_shape == array shape), single grid point.
    return pl.BlockSpec(shape, lambda: tuple(0 for _ in shape))


# ---------------------------------------------------------------------------
# Parameter init (deterministic, PyTorch-Linear-like uniform(+-1/sqrt(fan_in)))
# ---------------------------------------------------------------------------
def init_mlp_params(key, in_feature, hidden_feature, hidden_layers, out_feature):
    dims = [in_feature] + [hidden_feature] * (1 + hidden_layers) + [out_feature]
    params = []
    for i in range(len(dims) - 1):
        fan_in, fan_out = dims[i], dims[i + 1]
        key, kw, kb = jax.random.split(key, 3)
        bound = 1.0 / jnp.sqrt(fan_in)
        w = jax.random.uniform(kw, (fan_in, fan_out), jnp.float32, -bound, bound)
        b = jax.random.uniform(kb, (fan_out,), jnp.float32, -bound, bound)
        params.append((w, b))
    return params


def pad_params(params):
    """Zero-pad weights/biases so every feature axis is a multiple of LANE.

    Padding is exact (extra rows/cols are zero and contribute nothing); the
    bias is stored as (1, F_pad) once so no reshape happens per forward call.
    """
    padded = []
    for w, b in params:
        fi, fo = w.shape
        fip, fop = _round_up(fi, LANE), _round_up(fo, LANE)
        wp = jnp.zeros((fip, fop), jnp.float32).at[:fi, :fo].set(w)
        bp = jnp.zeros((1, fop), jnp.float32).at[0, :fo].set(b)
        padded.append((wp, bp))
    return padded


# ---------------------------------------------------------------------------
# Forward pass (single fused pallas_call)
# ---------------------------------------------------------------------------
@functools.partial(jax.jit, static_argnums=(2, 3))
def mlp_forward(x, padded_params, in_feature, out_feature):
    n = x.shape[0]
    fin_pad = padded_params[0][0].shape[0]
    fout_pad = padded_params[-1][0].shape[1]
    num_layers = len(padded_params)

    # Lane-pad the input features (batch axis is NOT padded: BN statistics are
    # computed over the true batch).
    xp = jnp.zeros((n, fin_pad), jnp.float32).at[:, :in_feature].set(
        x.astype(jnp.float32))

    flat_wb = []
    in_specs = [_full_spec(xp.shape)]
    for w, b in padded_params:
        flat_wb.extend([w, b])
        in_specs.extend([_full_spec(w.shape), _full_spec(b.shape)])

    out_padded = pl.pallas_call(
        _make_fused_mlp_kernel(num_layers),
        out_shape=jax.ShapeDtypeStruct((n, fout_pad), jnp.float32),
        grid=(),
        in_specs=in_specs,
        out_specs=_full_spec((n, fout_pad)),
        compiler_params=pltpu.CompilerParams(vmem_limit_bytes=32 * 1024 * 1024),
    )(xp, *flat_wb)

    # Drop the padded lanes.
    return out_padded[:, :out_feature]


# Pure-JAX reference for sanity checking (unpadded params)
def mlp_forward_ref(x, params):
    h = x
    for (w, b) in params[:-1]:
        y = h @ w + b
        mean = jnp.mean(y, axis=0, keepdims=True)
        var = jnp.mean((y - mean) ** 2, axis=0, keepdims=True)
        h = jnp.maximum((y - mean) * jax.lax.rsqrt(var + BN_EPS), 0.0)
    w, b = params[-1]
    return jax.nn.sigmoid(h @ w + b)


if __name__ == "__main__":
    in_feature, hidden_feature, hidden_layers, out_feature = 8, 32, 2, 4
    batch = 8

    key = jax.random.PRNGKey(0)
    kx, kp = jax.random.split(key)
    x = jax.random.normal(kx, (batch, in_feature), jnp.float32)
    params = init_mlp_params(kp, in_feature, hidden_feature, hidden_layers, out_feature)
    padded_params = pad_params(params)

    # Sanity: fused whole-batch kernel assumes activations fit in VMEM.
    n_layers = len(padded_params)
    hid_pad = padded_params[0][0].shape[1]
    resident_bytes = (
        batch * hid_pad * 4 * (n_layers + 1)          # x + per-layer activations
        + sum(w.size * 4 + b.size * 4 for w, b in padded_params)
    )
    assert resident_bytes < 16 * 1024 * 1024, (
        "batch too large for fused whole-batch kernel; tile the batch "
        "(see TODO at top of file)")

    out = mlp_forward(x, padded_params, in_feature, out_feature)
    jax.block_until_ready(out)

    ref = mlp_forward_ref(x, params)
    assert out.shape == (batch, out_feature)
    assert jnp.allclose(out, ref, atol=1e-5, rtol=1e-5), "mismatch vs JAX reference"

    print("KERNEL_OK")
</pallas_src>

<mosaic_0001>
module attributes {stable_mosaic.version = 11 : i64} {
  func.func @kernel(%arg0: memref<8x128xf32, #tpu.memory_space<vmem>>, %arg1: memref<128x128xf32, #tpu.memory_space<vmem>>, %arg2: memref<1x128xf32, #tpu.memory_space<vmem>>, %arg3: memref<128x128xf32, #tpu.memory_space<vmem>>, %arg4: memref<1x128xf32, #tpu.memory_space<vmem>>, %arg5: memref<128x128xf32, #tpu.memory_space<vmem>>, %arg6: memref<1x128xf32, #tpu.memory_space<vmem>>, %arg7: memref<128x128xf32, #tpu.memory_space<vmem>>, %arg8: memref<1x128xf32, #tpu.memory_space<vmem>>, %arg9: memref<8x128xf32, #tpu.memory_space<vmem>>) attributes {dimension_semantics = [], scalar_prefetch = 0 : i64, scratch_operands = 0 : i64, tpu.core_type = #tpu.core_type<tc>} {
    %c0 = arith.constant 0 : index
    %c0_0 = arith.constant 0 : index
    %0 = vector.load %arg0[%c0, %c0_0] : memref<8x128xf32, #tpu.memory_space<vmem>>, vector<8x128xf32>
    %c0_1 = arith.constant 0 : index
    %c0_2 = arith.constant 0 : index
    %1 = vector.load %arg1[%c0_1, %c0_2] : memref<128x128xf32, #tpu.memory_space<vmem>>, vector<128x128xf32>
    %c0_3 = arith.constant 0 : index
    %c0_4 = arith.constant 0 : index
    %2 = vector.load %arg2[%c0_3, %c0_4] : memref<1x128xf32, #tpu.memory_space<vmem>>, vector<1x128xf32>
    %cst = arith.constant dense<0.000000e+00> : vector<8x128xf32>
    %3 = tpu.matmul %0, %1, %cst {dimension_numbers = #tpu.dot_dimension_numbers<[1], [0], [0], [1], [0, 0, 1, 1], [], []>} : vector<8x128xf32>, vector<128x128xf32>, vector<8x128xf32> -> vector<8x128xf32>
    %4 = vector.broadcast %2 : vector<1x128xf32> to vector<8x128xf32>
    %5 = arith.addf %3, %4 : vector<8x128xf32>
    %cst_5 = arith.constant dense<0.000000e+00> : vector<128xf32>
    %6 = vector.multi_reduction <add>, %5, %cst_5 [0] : vector<8x128xf32> to vector<128xf32>
    %7 = vector.shape_cast %6 : vector<128xf32> to vector<1x128xf32>
    %cst_6 = arith.constant 8.000000e+00 : f32
    %8 = vector.broadcast %cst_6 : f32 to vector<1x128xf32>
    %9 = arith.divf %7, %8 : vector<1x128xf32>
    %10 = vector.broadcast %9 : vector<1x128xf32> to vector<8x128xf32>
    %11 = arith.subf %5, %10 : vector<8x128xf32>
    %12 = arith.mulf %11, %11 : vector<8x128xf32>
    %cst_7 = arith.constant dense<0.000000e+00> : vector<128xf32>
    %13 = vector.multi_reduction <add>, %12, %cst_7 [0] : vector<8x128xf32> to vector<128xf32>
    %14 = vector.shape_cast %13 : vector<128xf32> to vector<1x128xf32>
    %cst_8 = arith.constant 8.000000e+00 : f32
    %15 = vector.broadcast %cst_8 : f32 to vector<1x128xf32>
    %16 = arith.divf %14, %15 : vector<1x128xf32>
    %cst_9 = arith.constant 9.99999974E-6 : f32
    %17 = vector.broadcast %cst_9 : f32 to vector<1x128xf32>
    %18 = arith.addf %16, %17 : vector<1x128xf32>
    %19 = math.rsqrt %18 : vector<1x128xf32>
    %20 = vector.broadcast %19 : vector<1x128xf32> to vector<8x128xf32>
    %21 = arith.mulf %11, %20 : vector<8x128xf32>
    %cst_10 = arith.constant 0.000000e+00 : f32
    %22 = vector.broadcast %cst_10 : f32 to vector<8x128xf32>
    %23 = arith.maximumf %21, %22 : vector<8x128xf32>
    %c0_11 = arith.constant 0 : index
    %c0_12 = arith.constant 0 : index
    %24 = vector.load %arg3[%c0_11, %c0_12] : memref<128x128xf32, #tpu.memory_space<vmem>>, vector<128x128xf32>
    %c0_13 = arith.constant 0 : index
    %c0_14 = arith.constant 0 : index
    %25 = vector.load %arg4[%c0_13, %c0_14] : memref<1x128xf32, #tpu.memory_space<vmem>>, vector<1x128xf32>
    %cst_15 = arith.constant dense<0.000000e+00> : vector<8x128xf32>
    %26 = tpu.matmul %23, %24, %cst_15 {dimension_numbers = #tpu.dot_dimension_numbers<[1], [0], [0], [1], [0, 0, 1, 1], [], []>} : vector<8x128xf32>, vector<128x128xf32>, vector<8x128xf32> -> vector<8x128xf32>
    %27 = vector.broadcast %25 : vector<1x128xf32> to vector<8x128xf32>
    %28 = arith.addf %26, %27 : vector<8x128xf32>
    %cst_16 = arith.constant dense<0.000000e+00> : vector<128xf32>
    %29 = vector.multi_reduction <add>, %28, %cst_16 [0] : vector<8x128xf32> to vector<128xf32>
    %30 = vector.shape_cast %29 : vector<128xf32> to vector<1x128xf32>
    %cst_17 = arith.constant 8.000000e+00 : f32
    %31 = vector.broadcast %cst_17 : f32 to vector<1x128xf32>
    %32 = arith.divf %30, %31 : vector<1x128xf32>
    %33 = vector.broadcast %32 : vector<1x128xf32> to vector<8x128xf32>
    %34 = arith.subf %28, %33 : vector<8x128xf32>
    %35 = arith.mulf %34, %34 : vector<8x128xf32>
    %cst_18 = arith.constant dense<0.000000e+00> : vector<128xf32>
    %36 = vector.multi_reduction <add>, %35, %cst_18 [0] : vector<8x128xf32> to vector<128xf32>
    %37 = vector.shape_cast %36 : vector<128xf32> to vector<1x128xf32>
    %cst_19 = arith.constant 8.000000e+00 : f32
    %38 = vector.broadcast %cst_19 : f32 to vector<1x128xf32>
    %39 = arith.divf %37, %38 : vector<1x128xf32>
    %cst_20 = arith.constant 9.99999974E-6 : f32
    %40 = vector.broadcast %cst_20 : f32 to vector<1x128xf32>
    %41 = arith.addf %39, %40 : vector<1x128xf32>
    %42 = math.rsqrt %41 : vector<1x128xf32>
    %43 = vector.broadcast %42 : vector<1x128xf32> to vector<8x128xf32>
    %44 = arith.mulf %34, %43 : vector<8x128xf32>
    %cst_21 = arith.constant 0.000000e+00 : f32
    %45 = vector.broadcast %cst_21 : f32 to vector<8x128xf32>
    %46 = arith.maximumf %44, %45 : vector<8x128xf32>
    %c0_22 = arith.constant 0 : index
    %c0_23 = arith.constant 0 : index
    %47 = vector.load %arg5[%c0_22, %c0_23] : memref<128x128xf32, #tpu.memory_space<vmem>>, vector<128x128xf32>
    %c0_24 = arith.constant 0 : index
    %c0_25 = arith.constant 0 : index
    %48 = vector.load %arg6[%c0_24, %c0_25] : memref<1x128xf32, #tpu.memory_space<vmem>>, vector<1x128xf32>
    %cst_26 = arith.constant dense<0.000000e+00> : vector<8x128xf32>
    %49 = tpu.matmul %46, %47, %cst_26 {dimension_numbers = #tpu.dot_dimension_numbers<[1], [0], [0], [1], [0, 0, 1, 1], [], []>} : vector<8x128xf32>, vector<128x128xf32>, vector<8x128xf32> -> vector<8x128xf32>
    %50 = vector.broadcast %48 : vector<1x128xf32> to vector<8x128xf32>
    %51 = arith.addf %49, %50 : vector<8x128xf32>
    %cst_27 = arith.constant dense<0.000000e+00> : vector<128xf32>
    %52 = vector.multi_reduction <add>, %51, %cst_27 [0] : vector<8x128xf32> to vector<128xf32>
    %53 = vector.shape_cast %52 : vector<128xf32> to vector<1x128xf32>
    %cst_28 = arith.constant 8.000000e+00 : f32
    %54 = vector.broadcast %cst_28 : f32 to vector<1x128xf32>
    %55 = arith.divf %53, %54 : vector<1x128xf32>
    %56 = vector.broadcast %55 : vector<1x128xf32> to vector<8x128xf32>
    %57 = arith.subf %51, %56 : vector<8x128xf32>
    %58 = arith.mulf %57, %57 : vector<8x128xf32>
    %cst_29 = arith.constant dense<0.000000e+00> : vector<128xf32>
    %59 = vector.multi_reduction <add>, %58, %cst_29 [0] : vector<8x128xf32> to vector<128xf32>
    %60 = vector.shape_cast %59 : vector<128xf32> to vector<1x128xf32>
    %cst_30 = arith.constant 8.000000e+00 : f32
    %61 = vector.broadcast %cst_30 : f32 to vector<1x128xf32>
    %62 = arith.divf %60, %61 : vector<1x128xf32>
    %cst_31 = arith.constant 9.99999974E-6 : f32
    %63 = vector.broadcast %cst_31 : f32 to vector<1x128xf32>
    %64 = arith.addf %62, %63 : vector<1x128xf32>
    %65 = math.rsqrt %64 : vector<1x128xf32>
    %66 = vector.broadcast %65 : vector<1x128xf32> to vector<8x128xf32>
    %67 = arith.mulf %57, %66 : vector<8x128xf32>
    %cst_32 = arith.constant 0.000000e+00 : f32
    %68 = vector.broadcast %cst_32 : f32 to vector<8x128xf32>
    %69 = arith.maximumf %67, %68 : vector<8x128xf32>
    %c0_33 = arith.constant 0 : index
    %c0_34 = arith.constant 0 : index
    %70 = vector.load %arg7[%c0_33, %c0_34] : memref<128x128xf32, #tpu.memory_space<vmem>>, vector<128x128xf32>
    %c0_35 = arith.constant 0 : index
    %c0_36 = arith.constant 0 : index
    %71 = vector.load %arg8[%c0_35, %c0_36] : memref<1x128xf32, #tpu.memory_space<vmem>>, vector<1x128xf32>
    %cst_37 = arith.constant dense<0.000000e+00> : vector<8x128xf32>
    %72 = tpu.matmul %69, %70, %cst_37 {dimension_numbers = #tpu.dot_dimension_numbers<[1], [0], [0], [1], [0, 0, 1, 1], [], []>} : vector<8x128xf32>, vector<128x128xf32>, vector<8x128xf32> -> vector<8x128xf32>
    %73 = vector.broadcast %71 : vector<1x128xf32> to vector<8x128xf32>
    %74 = arith.addf %72, %73 : vector<8x128xf32>
    %75 = arith.negf %74 : vector<8x128xf32>
    %76 = math.exp %75 : vector<8x128xf32>
    %cst_38 = arith.constant 1.000000e+00 : f32
    %77 = vector.broadcast %cst_38 : f32 to vector<8x128xf32>
    %78 = arith.addf %77, %76 : vector<8x128xf32>
    %79 = arith.divf %77, %78 : vector<8x128xf32>
    %c0_39 = arith.constant 0 : index
    %c0_40 = arith.constant 0 : index
    %80 = vector.load %arg9[%c0_39, %c0_40] : memref<8x128xf32, #tpu.memory_space<vmem>>, vector<8x128xf32>
    tpu.vector_store %arg9[%c0_39, %c0_40], %79 {strides = array<i32>} : memref<8x128xf32, #tpu.memory_space<vmem>>, vector<8x128xf32>,
    return
  }
}

</mosaic_0001>

<bundles_post_ra>
// kernel: mlp_forward.1
= control target key start
LH: loop header
LB: loop body
LE: loop exit
PB: predicated region body
PF: predicated region fallthrough
CT: control target
= control target key end

     0   :  { %14 = vsyncpa [#allocation3], 0  ;;  %s1024_s0 = inlined_call_operand.vmem [shape: f32[8,128], index: 0, kind: input, shape index: {}]   ;;  %s1025_s1 = inlined_call_operand.hbm [shape: f32[128,128], index: 1, kind: input, shape index: {}]   ;;  %s1026_s2 = inlined_call_operand.vmem [shape: f32[1,128], index: 2, kind: input, shape index: {}]   ;;  %s1027_s3 = inlined_call_operand.hbm [shape: f32[128,128], index: 3, kind: input, shape index: {}]   ;;  %s1028_s4 = inlined_call_operand.vmem [shape: f32[1,128], index: 4, kind: input, shape index: {}]   ;;  %s1029_s5 = inlined_call_operand.hbm [shape: f32[128,128], index: 5, kind: input, shape index: {}]   ;;  %s1030_s6 = inlined_call_operand.vmem [shape: f32[1,128], index: 6, kind: input, shape index: {}]   ;;  %s1031_s7 = inlined_call_operand.hbm [shape: f32[128,128], index: 7, kind: input, shape index: {}]   ;;  %s1032_s8 = inlined_call_operand.vmem [shape: f32[1,128], index: 8, kind: input, shape index: {}]   ;;  %s1033_s9 = inlined_call_operand.vmem [shape: f32[8,128], index: 9, kind: output, shape index: {}]  }
   0x1   :  { %15 = vsyncpa [#allocation5], 0 }
   0x2   :  { %16 = vsyncpa [#allocation8], 0  ;;  %s852_s30 = smov [#allocation4]   ;;  %s853_s11 = smov [#allocation2]  }
   0x3   :  { %s38_s10 = sshll.u32 %s852_s30, 4  ;;  %s24_s12 = sshll.u32 %s853_s11, 4  ;;  %s39_s10 = int_to_ptr.vmem [resolvable:$true] %s38_s10  ;;  %s25_s12 = int_to_ptr.vmem [resolvable:$true] %s24_s12 }
   0x4   :  { %s774_s13 = scalar_lea.vmem %s39_s10, 2048  ;;  %p779_p1 = scmp.lt.s32.totalorder %s39_s10, %s39_s10 }
   0x5   :  { %p775_p0 = scmp.ne.s32.totalorder %s39_s10, %s774_s13  ;;  %p780_p2 = scmp.lt.s32.totalorder %s774_s13, %s774_s13 }
   0x7   :  { %p781_p3 = por %p780_p2, %p779_p1 }
   0x9   :  { %p782_p4 = pnand %p781_p3, %p775_p0 }
   0xb   :  { %785 = shalt.err (!%p782_p4)
}
   0xc   :  { %s854_s14 = smov 128   ;;  %s855_s15 = smov 8  }
   0xd   :  { %44 = dma.hbm_to_vmem [thread:$0]  %s1027_s3, 2048, %s39_s10, [#allocation5], %s854_s14, %s854_s14, %s855_s15  }
   0xe   :  { %s794_s18 = scalar_lea.vmem %s25_s12, 2048  ;;  %p799_p6 = scmp.lt.s32.totalorder %s25_s12, %s25_s12 }
   0xf   :  { %p795_p5 = scmp.ne.s32.totalorder %s25_s12, %s794_s18  ;;  %p800_p7 = scmp.lt.s32.totalorder %s794_s18, %s794_s18 }
  0x11   :  { %p801_p8 = por %p800_p7, %p799_p6 }
  0x13   :  { %p802_p9 = pnand %p801_p8, %p795_p5 }
  0x15   :  { %805 = shalt.err (!%p802_p9)
}
  0x16   :  { %30 = dma.hbm_to_vmem [thread:$0]  %s1025_s1, 2048, %s25_s12, [#allocation3], %s854_s14, %s854_s14, %s855_s15  }
  0x17   :  { %s856_s21 = smov [#allocation6]   ;;  %s857_s23 = smov [#allocation7]  }
  0x18   :  { %s52_s22 = sshll.u32 %s856_s21, 4  ;;  %s66_s24 = sshll.u32 %s857_s23, 4  ;;  %s53_s22 = int_to_ptr.vmem [resolvable:$true] %s52_s22  ;;  %s67_s24 = int_to_ptr.vmem [resolvable:$true] %s66_s24 }
  0x19   :  { %s814_s3 = scalar_lea.vmem %s53_s22, 2048  ;;  %p819_p11 = scmp.lt.s32.totalorder %s53_s22, %s53_s22 }
  0x1a   :  { %p815_p10 = scmp.ne.s32.totalorder %s53_s22, %s814_s3  ;;  %p820_p12 = scmp.lt.s32.totalorder %s814_s3, %s814_s3 }
  0x1c   :  { %p821_p13 = por %p820_p12, %p819_p11 }
  0x1e   :  { %p822_p0 = pnand %p821_p13, %p815_p10 }
  0x20   :  { %825 = shalt.err (!%p822_p0)
}
  0x21   :  { %58 = dma.hbm_to_vmem [thread:$0]  %s1029_s5, 2048, %s53_s22, [#allocation5], %s854_s14, %s854_s14, %s855_s15  }
  0x22   :  { %s834_s1 = scalar_lea.vmem %s67_s24, 2048  ;;  %p839_p2 = scmp.lt.s32.totalorder %s67_s24, %s67_s24 }
  0x23   :  { %p835_p1 = scmp.ne.s32.totalorder %s67_s24, %s834_s1  ;;  %p840_p3 = scmp.lt.s32.totalorder %s834_s1, %s834_s1 }
  0x25   :  { %p841_p4 = por %p840_p3, %p839_p2 }
  0x27   :  { %p842_p5 = pnand %p841_p4, %p835_p1 }
  0x29   :  { %845 = shalt.err (!%p842_p5)
}
  0x2a   :  { %72 = dma.hbm_to_vmem [thread:$0]  %s1031_s7, 2048, %s67_s24, [#allocation8], %s854_s14, %s854_s14, %s855_s15  }
  0x2b   :  { %846 = dma.done.wait [#allocation3], 2048  }
  0x2c   :  { %847 = vsyncadd [#allocation3], 4294965248 }
  0x2d   :  { %848 = dma.done.wait [#allocation5], 4096  }
  0x2e   :  { %849 = vsyncadd [#allocation5], 4294963200 }
  0x2f   :  { %850 = dma.done.wait [#allocation8], 2048  }
  0x30   :  { %851 = vsyncadd [#allocation8], 4294965248  ;;  %v858_v0 = vmov 0.0   ;;  %vm859_vm0 = vmmov 0   ;;  %v103_v1 = vld [vmem:[#allocation2 + $0x78] sm:$0xff]  ;;  %v102_v2 = vld [vmem:[#allocation2 + $0x70] sm:$0xff] }
  0x31   :  { %608 = vmatprep.subr.mxu0 %v858_v0  ;;  %640 = vmatprep.mubr.msk.f32.mxu0 %vm859_vm0, %v858_v0  ;;  %v101_v3 = vld [vmem:[#allocation2 + $0x68] sm:$0xff]  ;;  %v100_v4 = vld [vmem:[#allocation2 + $0x60] sm:$0xff]  ;;  %v99_v5 = vld [vmem:[#allocation2 + $0x58] sm:$0xff] }
  0x32   :  { %643 = vmatprep.subr.mxu1 %v858_v0  ;;  %675 = vmatprep.mubr.msk.f32.mxu1 %vm859_vm0, %v858_v0  ;;  %v98_v6 = vld [vmem:[#allocation2 + $0x50] sm:$0xff]  ;;  %v97_v7 = vld [vmem:[#allocation2 + $0x48] sm:$0xff]  ;;  %v96_v8 = vld [vmem:[#allocation2 + $0x40] sm:$0xff] }
  0x33   :  { %609 = vmatpush3.msra.mxu0 %v103_v1  ;;  %v95_v9 = vld [vmem:[#allocation2 + $0x38] sm:$0xff]  ;;  %v94_v10 = vld [vmem:[#allocation2 + $0x30] sm:$0xff]  ;;  %v93_v11 = vld [vmem:[#allocation2 + $0x28] sm:$0xff] }
  0x34   :  { %610 = vmatprep.subr.mxu0 %v858_v0  ;;  %v92_v12 = vld [vmem:[#allocation2 + $0x20] sm:$0xff]  ;;  %v91_v13 = vld [vmem:[#allocation2 + $0x18] sm:$0xff]  ;;  %v90_v14 = vld [vmem:[#allocation2 + $0x10] sm:$0xff] }
  0x35   :  { %611 = vmatpush3.msra.mxu0 %v102_v2  ;;  %v89_v15 = vld [vmem:[#allocation2 + $0x8] sm:$0xff]  ;;  %v88_v16 = vld [vmem:[#allocation2] sm:$0xff]  ;;  %v217_v18 = vld [vmem:[#allocation4 + $0x78] sm:$0xff] }
  0x36   :  { %612 = vmatprep.subr.mxu0 %v858_v0  ;;  %v87_v17 = vld [vmem:[%s1024_s0] sm:$0xff]  ;;  %644 = vmatpush3.msra.mxu1 %v217_v18  ;;  %v216_v19 = vld [vmem:[#allocation4 + $0x70] sm:$0xff]  ;;  %v215_v20 = vld [vmem:[#allocation4 + $0x68] sm:$0xff] }
  0x37   :  { %613 = vmatpush3.msra.mxu0 %v101_v3  ;;  %645 = vmatprep.subr.mxu1 %v858_v0  ;;  %v214_v21 = vld [vmem:[#allocation4 + $0x60] sm:$0xff]  ;;  %v213_v22 = vld [vmem:[#allocation4 + $0x58] sm:$0xff]  ;;  %v212_v23 = vld [vmem:[#allocation4 + $0x50] sm:$0xff] }
  0x38   :  { %614 = vmatprep.subr.mxu0 %v858_v0  ;;  %646 = vmatpush3.msra.mxu1 %v216_v19  ;;  %v211_v24 = vld [vmem:[#allocation4 + $0x48] sm:$0xff]  ;;  %v210_v25 = vld [vmem:[#allocation4 + $0x40] sm:$0xff]  ;;  %v209_v26 = vld [vmem:[#allocation4 + $0x38] sm:$0xff] }
  0x39   :  { %615 = vmatpush3.msra.mxu0 %v100_v4  ;;  %647 = vmatprep.subr.mxu1 %v858_v0  ;;  %v208_v27 = vld [vmem:[#allocation4 + $0x30] sm:$0xff]  ;;  %v207_v28 = vld [vmem:[#allocation4 + $0x28] sm:$0xff]  ;;  %v206_v29 = vld [vmem:[#allocation4 + $0x20] sm:$0xff] }
  0x3a   :  { %616 = vmatprep.subr.mxu0 %v858_v0  ;;  %648 = vmatpush3.msra.mxu1 %v215_v20  ;;  %v205_v30 = vld [vmem:[#allocation4 + $0x18] sm:$0xff]  ;;  %v204_v31 = vld [vmem:[#allocation4 + $0x10] sm:$0xff]  ;;  %v203_v32 = vld [vmem:[#allocation4 + $0x8] sm:$0xff] }
  0x3b   :  { %617 = vmatpush3.msra.mxu0 %v99_v5  ;;  %649 = vmatprep.subr.mxu1 %v858_v0  ;;  %v202_v33 = vld [vmem:[#allocation4] sm:$0xff]  ;;  %v330_v58 = vld [vmem:[#allocation6 + $0x78] sm:$0xff]  ;;  %v329_v59 = vld [vmem:[#allocation6 + $0x70] sm:$0xff] }
  0x3c   :  { %618 = vmatprep.subr.mxu0 %v858_v0  ;;  %650 = vmatpush3.msra.mxu1 %v214_v21  ;;  %v535_v34 = vld [vmem:[%s1026_s2] ss:$0 sm:$0xff]  ;;  %v328_v60 = vld [vmem:[#allocation6 + $0x68] sm:$0xff]  ;;  %v326_v62 = vld [vmem:[#allocation6 + $0x58] sm:$0xff] }
  0x3d   :  { %619 = vmatpush3.msra.mxu0 %v98_v6  ;;  %651 = vmatprep.subr.mxu1 %v858_v0  ;;  %v327_v61 = vld [vmem:[#allocation6 + $0x60] sm:$0xff]  ;;  %v325_v63 = vld [vmem:[#allocation6 + $0x50] sm:$0xff]  ;;  %v324_v1 = vld [vmem:[#allocation6 + $0x48] sm:$0xff] }
  0x3e   :  { %620 = vmatprep.subr.mxu0 %v858_v0  ;;  %652 = vmatpush3.msra.mxu1 %v213_v22  ;;  %v323_v2 = vld [vmem:[#allocation6 + $0x40] sm:$0xff]  ;;  %v322_v3 = vld [vmem:[#allocation6 + $0x38] sm:$0xff]  ;;  %v321_v4 = vld [vmem:[#allocation6 + $0x30] sm:$0xff] }
  0x3f   :  { %621 = vmatpush3.msra.mxu0 %v97_v7  ;;  %653 = vmatprep.subr.mxu1 %v858_v0  ;;  %v320_v5 = vld [vmem:[#allocation6 + $0x28] sm:$0xff]  ;;  %v319_v6 = vld [vmem:[#allocation6 + $0x20] sm:$0xff]  ;;  %v318_v7 = vld [vmem:[#allocation6 + $0x18] sm:$0xff] }
  0x40   :  { %622 = vmatprep.subr.mxu0 %v858_v0  ;;  %654 = vmatpush3.msra.mxu1 %v212_v23 }
  0x41   :  { %623 = vmatpush3.msra.mxu0 %v96_v8  ;;  %655 = vmatprep.subr.mxu1 %v858_v0  ;;  %v317_v8 = vld [vmem:[#allocation6 + $0x10] sm:$0xff] }
  0x42   :  { %624 = vmatprep.subr.mxu0 %v858_v0  ;;  %656 = vmatpush3.msra.mxu1 %v211_v24 }
  0x43   :  { %625 = vmatpush3.msra.mxu0 %v95_v9  ;;  %657 = vmatprep.subr.mxu1 %v858_v0  ;;  %v316_v9 = vld [vmem:[#allocation6 + $0x8] sm:$0xff] }
  0x44   :  { %626 = vmatprep.subr.mxu0 %v858_v0  ;;  %658 = vmatpush3.msra.mxu1 %v210_v25 }
  0x45   :  { %627 = vmatpush3.msra.mxu0 %v94_v10  ;;  %659 = vmatprep.subr.mxu1 %v858_v0  ;;  %v315_v10 = vld [vmem:[#allocation6] sm:$0xff] }
  0x46   :  { %628 = vmatprep.subr.mxu0 %v858_v0  ;;  %660 = vmatpush3.msra.mxu1 %v209_v26 }
  0x47   :  { %629 = vmatpush3.msra.mxu0 %v93_v11  ;;  %661 = vmatprep.subr.mxu1 %v858_v0  ;;  %v536_v11 = vld [vmem:[%s1028_s4] ss:$0 sm:$0xff] }
  0x48   :  { %630 = vmatprep.subr.mxu0 %v858_v0  ;;  %662 = vmatpush3.msra.mxu1 %v208_v27 }
  0x49   :  { %631 = vmatpush3.msra.mxu0 %v92_v12  ;;  %663 = vmatprep.subr.mxu1 %v858_v0 }
  0x4a   :  { %632 = vmatprep.subr.mxu0 %v858_v0  ;;  %664 = vmatpush3.msra.mxu1 %v207_v28 }
  0x4b   :  { %633 = vmatpush3.msra.mxu0 %v91_v13  ;;  %665 = vmatprep.subr.mxu1 %v858_v0 }
  0x4c   :  { %634 = vmatprep.subr.mxu0 %v858_v0  ;;  %666 = vmatpush3.msra.mxu1 %v206_v29 }
  0x4d   :  { %635 = vmatpush3.msra.mxu0 %v90_v14  ;;  %667 = vmatprep.subr.mxu1 %v858_v0 }
  0x4e   :  { %636 = vmatprep.subr.mxu0 %v858_v0  ;;  %668 = vmatpush3.msra.mxu1 %v205_v30 }
  0x4f   :  { %637 = vmatpush3.msra.mxu0 %v89_v15  ;;  %669 = vmatprep.subr.mxu1 %v858_v0 }
  0x50   :  { %638 = vmatprep.subr.mxu0 %v858_v0  ;;  %670 = vmatpush3.msra.mxu1 %v204_v31 }
  0x51   :  { %639 = vmatpush3.msra.mxu0 %v88_v16  ;;  %671 = vmatprep.subr.mxu1 %v858_v0 }
  0x52   :  { %641 = vmatmul.mubr.f32.vlgmr.msra.gmra.mxu0 %v87_v17  ;;  %678 = vmatprep.subr.mxu0 %v858_v0 }
  0x53   :  { %710 = vmatprep.mubr.msk.f32.mxu0 %vm859_vm0, %v858_v0  ;;  %672 = vmatpush3.msra.mxu1 %v203_v32 }
  0x54   :  { %673 = vmatprep.subr.mxu1 %v858_v0  ;;  %679 = vmatpush3.msra.mxu0 %v330_v58 }
  0x55   :  { %674 = vmatpush3.msra.mxu1 %v202_v33  ;;  %680 = vmatprep.subr.mxu0 %v858_v0 }
  0x56   :  { %713 = vmatprep.subr.mxu1 %v858_v0  ;;  %681 = vmatpush3.msra.mxu0 %v329_v59 }
  0x57   :  { %682 = vmatprep.subr.mxu0 %v858_v0 }
  0x58   :  { %683 = vmatpush3.msra.mxu0 %v328_v60 }
  0x59   :  { %684 = vmatprep.subr.mxu0 %v858_v0 }
  0x5a   :  { %685 = vmatpush3.msra.mxu0 %v327_v61 }
  0x5b   :  { %686 = vmatprep.subr.mxu0 %v858_v0 }
  0x5c   :  { %687 = vmatpush3.msra.mxu0 %v326_v62 }
  0x5d   :  { %688 = vmatprep.subr.mxu0 %v858_v0 }
  0x5e   :  { %689 = vmatpush3.msra.mxu0 %v325_v63 }
  0x5f   :  { %690 = vmatprep.subr.mxu0 %v858_v0 }
  0x60   :  { %691 = vmatpush3.msra.mxu0 %v324_v1 }
  0x61   :  { %692 = vmatprep.subr.mxu0 %v858_v0 }
  0x62   :  { %693 = vmatpush3.msra.mxu0 %v323_v2 }
  0x63   :  { %694 = vmatprep.subr.mxu0 %v858_v0 }
  0x64   :  { %695 = vmatpush3.msra.mxu0 %v322_v3 }
  0x65   :  { %696 = vmatprep.subr.mxu0 %v858_v0 }
  0x66   :  { %697 = vmatpush3.msra.mxu0 %v321_v4 }
  0x67   :  { %698 = vmatprep.subr.mxu0 %v858_v0 }
  0x68   :  { %699 = vmatpush3.msra.mxu0 %v320_v5 }
  0x69   :  { %700 = vmatprep.subr.mxu0 %v858_v0 }
  0x6a   :  { %701 = vmatpush3.msra.mxu0 %v319_v6 }
  0x6b   :  { %702 = vmatprep.subr.mxu0 %v858_v0 }
  0x6c   :  { %703 = vmatpush3.msra.mxu0 %v318_v7 }
  0x6d   :  { %704 = vmatprep.subr.mxu0 %v858_v0 }
  0x6e   :  { %705 = vmatpush3.msra.mxu0 %v317_v8 }
  0x6f   :  { %706 = vmatprep.subr.mxu0 %v858_v0 }
  0x70   :  { %707 = vmatpush3.msra.mxu0 %v316_v9 }
  0x71   :  { %708 = vmatprep.subr.mxu0 %v858_v0 }
  0x72   :  { %709 = vmatpush3.msra.mxu0 %v315_v10 }
 0x112   :  { %v177_v35 = vpop.f32.mrf.mxu0 }
 0x113   :  { %v178_v36 = vadd.f32 %v535_v34, %v177_v35  ;;  %v443_v35 = vld [vmem:[#allocation7 + $0x78] sm:$0xff] }
 0x114   :  { %v642_v37 = vpop.f32.mrf.mxu0 }
 0x115   :  { %v181_v38 = vrot.slane %v178_v36, 4  ;;  %v441_v37 = vld [vmem:[#allocation7 + $0x68] sm:$0xff] }
 0x117   :  { %v182_v39 = vadd.f32 %v181_v38, %v178_v36  ;;  %v440_v38 = vld [vmem:[#allocation7 + $0x60] sm:$0xff] }
 0x119   :  { %v183_v40 = vrot.slane %v182_v39, 2 }
 0x11b   :  { %v184_v41 = vadd.f32 %v183_v40, %v182_v39  ;;  %v439_v39 = vld [vmem:[#allocation7 + $0x58] sm:$0xff]  ;;  %v438_v40 = vld [vmem:[#allocation7 + $0x50] sm:$0xff] }
 0x11d   :  { %v185_v42 = vrot.slane %v184_v41, 1 }
 0x11f   :  { %v186_v43 = vadd.f32 %v185_v42, %v184_v41  ;;  %v437_v41 = vld [vmem:[#allocation7 + $0x48] sm:$0xff]  ;;  %v436_v42 = vld [vmem:[#allocation7 + $0x40] sm:$0xff] }
 0x121   :  { %v188_v44 = vmul.f32 0.125, %v186_v43  ;;  %v435_v43 = vld [vmem:[#allocation7 + $0x38] sm:$0xff] }
 0x123   :  { %v189_v45 = vsub.f32 %v178_v36, %v188_v44  ;;  %v442_v36 = vld [vmem:[#allocation7 + $0x70] sm:$0xff] }
 0x124   :  { %v434_v44 = vld [vmem:[#allocation7 + $0x30] sm:$0xff] }
 0x125   :  { %v190_v46 = vmul.f32 %v189_v45, %v189_v45 }
 0x127   :  { %v191_v47 = vrot.slane %v190_v46, 4 }
 0x129   :  { %v192_v48 = vadd.f32 %v191_v47, %v190_v46  ;;  %v432_v46 = vld [vmem:[#allocation7 + $0x20] sm:$0xff]  ;;  %v431_v47 = vld [vmem:[#allocation7 + $0x18] sm:$0xff] }
 0x12b   :  { %v193_v49 = vrot.slane %v192_v48, 2 }
 0x12d   :  { %v194_v50 = vadd.f32 %v193_v49, %v192_v48  ;;  %v430_v48 = vld [vmem:[#allocation7 + $0x10] sm:$0xff]  ;;  %v429_v49 = vld [vmem:[#allocation7 + $0x8] sm:$0xff] }
 0x12f   :  { %v195_v51 = vrot.slane %v194_v50, 1 }
 0x131   :  { %v196_v52 = vadd.f32 %v195_v51, %v194_v50  ;;  %v428_v50 = vld [vmem:[#allocation7] sm:$0xff] }
 0x132   :  { %v537_v51 = vld [vmem:[%s1030_s6] ss:$0 sm:$0xff] }
 0x133   :  { %v197_v53 = vmul.f32 0.125, %v196_v52 }
 0x135   :  { %v198_v54 = vadd.f32 1e-05, %v197_v53 }
 0x137   :  { %756 = vrsqrt.f32 %v198_v54 }
 0x144   :  { %v757_v55 = vpop.eup %756 }
 0x145   :  { %v200_v56 = vmul.f32 %v757_v55, %v189_v45  ;;  %v433_v45 = vld [vmem:[#allocation7 + $0x28] sm:$0xff] }
 0x147   :  { %v201_v57 = vmax.f32 %v200_v56, 0.0 }
 0x149   :  { %676 = vmatmul.mubr.f32.vlgmr.msra.gmra.mxu1 %v201_v57 }
 0x14a   :  { %745 = vmatprep.mubr.msk.f32.mxu1 %vm859_vm0, %v858_v0  ;;  %714 = vmatpush3.msra.mxu1 %v443_v35 }
 0x14b   :  { %715 = vmatprep.subr.mxu1 %v858_v0 }
 0x14c   :  { %716 = vmatpush3.msra.mxu1 %v442_v36 }
 0x14d   :  { %717 = vmatprep.subr.mxu1 %v858_v0 }
 0x14e   :  { %718 = vmatpush3.msra.mxu1 %v441_v37 }
 0x14f   :  { %719 = vmatprep.subr.mxu1 %v858_v0 }
 0x150   :  { %720 = vmatpush3.msra.mxu1 %v440_v38 }
 0x151   :  { %721 = vmatprep.subr.mxu1 %v858_v0 }
 0x152   :  { %722 = vmatpush3.msra.mxu1 %v439_v39 }
 0x153   :  { %723 = vmatprep.subr.mxu1 %v858_v0 }
 0x154   :  { %724 = vmatpush3.msra.mxu1 %v438_v40 }
 0x155   :  { %725 = vmatprep.subr.mxu1 %v858_v0 }
 0x156   :  { %726 = vmatpush3.msra.mxu1 %v437_v41 }
 0x157   :  { %727 = vmatprep.subr.mxu1 %v858_v0 }
 0x158   :  { %728 = vmatpush3.msra.mxu1 %v436_v42 }
 0x159   :  { %729 = vmatprep.subr.mxu1 %v858_v0 }
 0x15a   :  { %730 = vmatpush3.msra.mxu1 %v435_v43 }
 0x15b   :  { %731 = vmatprep.subr.mxu1 %v858_v0 }
 0x15c   :  { %732 = vmatpush3.msra.mxu1 %v434_v44 }
 0x15d   :  { %733 = vmatprep.subr.mxu1 %v858_v0 }
 0x15e   :  { %734 = vmatpush3.msra.mxu1 %v433_v45 }
 0x15f   :  { %735 = vmatprep.subr.mxu1 %v858_v0 }
 0x160   :  { %736 = vmatpush3.msra.mxu1 %v432_v46 }
 0x161   :  { %737 = vmatprep.subr.mxu1 %v858_v0 }
 0x162   :  { %738 = vmatpush3.msra.mxu1 %v431_v47 }
 0x163   :  { %739 = vmatprep.subr.mxu1 %v858_v0 }
 0x164   :  { %740 = vmatpush3.msra.mxu1 %v430_v48 }
 0x165   :  { %741 = vmatprep.subr.mxu1 %v858_v0 }
 0x166   :  { %742 = vmatpush3.msra.mxu1 %v429_v49 }
 0x167   :  { %743 = vmatprep.subr.mxu1 %v858_v0 }
 0x168   :  { %744 = vmatpush3.msra.mxu1 %v428_v50 }
 0x209   :  { %v291_v12 = vpop.f32.mrf.mxu1 }
 0x20a   :  { %v292_v13 = vadd.f32 %v536_v11, %v291_v12  ;;  %v538_v11 = vld [vmem:[%s1032_s8] ss:$0 sm:$0xff] }
 0x20b   :  { %v677_v14 = vpop.f32.mrf.mxu1 }
 0x20c   :  { %v295_v15 = vrot.slane %v292_v13, 4 }
 0x20e   :  { %v296_v16 = vadd.f32 %v295_v15, %v292_v13 }
 0x210   :  { %v297_v17 = vrot.slane %v296_v16, 2 }
 0x212   :  { %v298_v18 = vadd.f32 %v297_v17, %v296_v16 }
 0x214   :  { %v299_v19 = vrot.slane %v298_v18, 1 }
 0x216   :  { %v300_v20 = vadd.f32 %v299_v19, %v298_v18 }
 0x218   :  { %v301_v21 = vmul.f32 0.125, %v300_v20 }
 0x21a   :  { %v302_v22 = vsub.f32 %v292_v13, %v301_v21 }
 0x21c   :  { %v303_v23 = vmul.f32 %v302_v22, %v302_v22 }
 0x21e   :  { %v304_v24 = vrot.slane %v303_v23, 4 }
 0x220   :  { %v305_v25 = vadd.f32 %v304_v24, %v303_v23 }
 0x222   :  { %v306_v26 = vrot.slane %v305_v25, 2 }
 0x224   :  { %v307_v27 = vadd.f32 %v306_v26, %v305_v25 }
 0x226   :  { %v308_v28 = vrot.slane %v307_v27, 1 }
 0x228   :  { %v309_v29 = vadd.f32 %v308_v28, %v307_v27 }
 0x22a   :  { %v310_v30 = vmul.f32 0.125, %v309_v29 }
 0x22c   :  { %v311_v31 = vadd.f32 1e-05, %v310_v30 }
 0x22e   :  { %758 = vrsqrt.f32 %v311_v31 }
 0x23b   :  { %v759_v32 = vpop.eup %758 }
 0x23c   :  { %v313_v33 = vmul.f32 %v759_v32, %v302_v22 }
 0x23e   :  { %v314_v34 = vmax.f32 %v313_v33, 0.0 }
 0x240   :  { %711 = vmatmul.mubr.f32.vlgmr.msra.gmra.mxu0 %v314_v34 }
 0x300   :  { %v404_v52 = vpop.f32.mrf.mxu0 }
 0x301   :  { %v405_v53 = vadd.f32 %v537_v51, %v404_v52 }
 0x302   :  { %v712_v54 = vpop.f32.mrf.mxu0 }
 0x303   :  { %v408_v55 = vrot.slane %v405_v53, 4 }
 0x305   :  { %v409_v56 = vadd.f32 %v408_v55, %v405_v53 }
 0x307   :  { %v410_v57 = vrot.slane %v409_v56, 2 }
 0x309   :  { %v411_v58 = vadd.f32 %v410_v57, %v409_v56 }
 0x30b   :  { %v412_v59 = vrot.slane %v411_v58, 1 }
 0x30d   :  { %v413_v60 = vadd.f32 %v412_v59, %v411_v58 }
 0x30f   :  { %v414_v61 = vmul.f32 0.125, %v413_v60 }
 0x311   :  { %v415_v62 = vsub.f32 %v405_v53, %v414_v61 }
 0x313   :  { %v416_v63 = vmul.f32 %v415_v62, %v415_v62 }
 0x315   :  { %v417_v1 = vrot.slane %v416_v63, 4 }
 0x317   :  { %v418_v2 = vadd.f32 %v417_v1, %v416_v63 }
 0x319   :  { %v419_v0 = vrot.slane %v418_v2, 2 }
 0x31b   :  { %v420_v3 = vadd.f32 %v419_v0, %v418_v2 }
 0x31d   :  { %v421_v4 = vrot.slane %v420_v3, 1 }
 0x31f   :  { %v422_v5 = vadd.f32 %v421_v4, %v420_v3 }
 0x321   :  { %v423_v6 = vmul.f32 0.125, %v422_v5 }
 0x323   :  { %v424_v7 = vadd.f32 1e-05, %v423_v6 }
 0x325   :  { %760 = vrsqrt.f32 %v424_v7 }
 0x332   :  { %v761_v8 = vpop.eup %760 }
 0x333   :  { %v426_v9 = vmul.f32 %v761_v8, %v415_v62 }
 0x335   :  { %v427_v10 = vmax.f32 %v426_v9, 0.0 }
 0x337   :  { %746 = vmatmul.mubr.f32.vlgmr.msra.gmra.mxu1 %v427_v10 }
 0x3f7   :  { %v517_v12 = vpop.f32.mrf.mxu1 }
 0x3f8   :  { %v518_v13 = vadd.f32 %v538_v11, %v517_v12 }
 0x3f9   :  { %v747_v14 = vpop.f32.mrf.mxu1 }
 0x3fa   :  { %v539_v15 = vmul.f32 -1.442695, %v518_v13 }
 0x3fc   :  { %762 = vpow2.f32 %v539_v15 }
 0x409   :  { %v763_v16 = vpop.eup %762 }
 0x40a   :  { %v524_v17 = vadd.f32 1.0, %v763_v16 }
 0x40c   :  { %764 = vrcp.f32 %v524_v17 }
 0x419   :  { %v765_v18 = vpop.eup %764 }
 0x41a   :  { %527 = vst [vmem:[%s1033_s9] sm:$0xff] %v765_v18 }
 0x41b   :  { %532 = vsyncpa [#allocation3], 1 }
 0x41c   :  { %533 = vsyncpa [#allocation5], 1 }
 0x41d   :  { %534 = vsyncpa [#allocation8], 1 }

</bundles_post_ra>
